<compile_context>
chip_gen: v5e
topology: v5e:2x2
jax: 0.10.0
libtpu: 0.0.40
codegen_flags: <defaults>
</compile_context>

<pallas_src>
import math

import jax
import jax.numpy as jnp
from jax import lax
from jax.experimental import pallas as pl
from jax.experimental.pallas import tpu as pltpu  # noqa: F401  (TPU backend)


def _round_up(x, m):
    return ((x + m - 1) // m) * m


# ---------------------------------------------------------------------------
# Pallas kernel 1 (init-time, runs once): full-table MLP
#     (tbl @ W1 + b1) -> SiLU -> (@ W2 + b2) -> SiLU
# ---------------------------------------------------------------------------
def _mlp_kernel(x_ref, w1_ref, b1_ref, w2_ref, b2_ref, o_ref):
    x = x_ref[...]                                                    # [T, E] f32
    h = jnp.dot(x, w1_ref[...], preferred_element_type=jnp.float32) + b1_ref[...]
    h = h * jax.nn.sigmoid(h)                                         # SiLU (f32 EUP)
    y = jnp.dot(h, w2_ref[...], preferred_element_type=jnp.float32) + b2_ref[...]
    o_ref[...] = y * jax.nn.sigmoid(y)                                # SiLU


def diffusion_embedding_mlp(x, w1, b1, w2, b2):
    """x: [T, E], w1: [E, P], b1: [P], w2: [P, P], b2: [P] -> [T, P] f32."""
    T, E = x.shape
    P = w1.shape[1]
    full = lambda shape: pl.BlockSpec(shape, lambda: (0,) * len(shape))
    return pl.pallas_call(
        _mlp_kernel,
        out_shape=jax.ShapeDtypeStruct((T, P), jnp.float32),
        grid=(),                                   # single invocation, full blocks
        in_specs=[
            full((T, E)),
            full((E, P)),
            full((1, P)),
            full((P, P)),
            full((1, P)),
        ],
        out_specs=full((T, P)),
    )(x, w1, b1.reshape(1, P), w2, b2.reshape(1, P))


# ---------------------------------------------------------------------------
# Pallas kernel 2 (forward-time): single-shot gather.
# Whole table resident in VMEM; gather = one-hot MXU matmul; one dense
# [Bpad, P] output block (unmasked stores, single writeback DMA).
# ---------------------------------------------------------------------------
def _gather_kernel(steps_ref, table_ref, o_ref):
    steps = steps_ref[...]                                            # [Bp, 1] int32
    Bp = steps.shape[0]
    Tp = table_ref.shape[0]
    t_ids = lax.broadcasted_iota(jnp.int32, (Bp, Tp), 1)              # [Bp, Tp]
    onehot = (t_ids == steps).astype(jnp.float32)                     # row gather mask
    o_ref[...] = jnp.dot(onehot, table_ref[...],
                         preferred_element_type=jnp.float32)          # [Bp, P]


def gather_rows(table_pad, steps_i32):
    """table_pad: [Tp, P] f32 (Tp % 8 == 0), steps_i32: [B] int32 -> [B, P] f32."""
    Tp, P = table_pad.shape
    B = int(steps_i32.shape[0])
    Bp = _round_up(max(B, 1), 8)                                      # sublane-dense output
    steps_pad = jnp.pad(steps_i32, (0, Bp - B)).reshape(Bp, 1)
    full = lambda shape: pl.BlockSpec(shape, lambda: (0,) * len(shape))
    out = pl.pallas_call(
        _gather_kernel,
        out_shape=jax.ShapeDtypeStruct((Bp, P), jnp.float32),
        grid=(),                                   # single grid step: no per-row overhead
        in_specs=[full((Bp, 1)), full((Tp, P))],
        out_specs=full((Bp, P)),
    )(steps_pad, table_pad)
    return out[:B]


# ---------------------------------------------------------------------------
# Module-equivalent wrapper
# ---------------------------------------------------------------------------
def build_embedding_table(num_steps, half_dim):
    """Matches DiffusionEmbedding._build_embedding(num_steps, embedding_dim/2)."""
    half_dim = int(half_dim)
    steps = jnp.arange(num_steps, dtype=jnp.float32)[:, None]             # [T, 1]
    freqs = 10.0 ** (jnp.arange(half_dim, dtype=jnp.float32)
                     / (half_dim - 1) * 4.0)[None, :]                     # [1, D]
    table = steps * freqs                                                 # [T, D]
    return jnp.concatenate([jnp.sin(table), jnp.cos(table)], axis=1)      # [T, 2D]


class DiffusionEmbeddingPallas:
    def __init__(self, num_steps, embedding_dim=128, projection_dim=None, key=None):
        if projection_dim is None:
            projection_dim = embedding_dim
        self.num_steps = int(num_steps)
        self.embedding_dim = int(embedding_dim)
        self.projection_dim = int(projection_dim)
        self.embedding = build_embedding_table(num_steps, embedding_dim // 2)  # [T, E]

        if key is None:
            key = jax.random.PRNGKey(0)
        k1, k2, k3, k4 = jax.random.split(key, 4)
        # Deterministic init mimicking nn.Linear's uniform(-1/sqrt(in), 1/sqrt(in)).
        lim1 = 1.0 / math.sqrt(embedding_dim)
        lim2 = 1.0 / math.sqrt(projection_dim)
        # Stored pre-transposed: [in, out]
        self.w1 = jax.random.uniform(k1, (embedding_dim, projection_dim),
                                     jnp.float32, -lim1, lim1)
        self.b1 = jax.random.uniform(k2, (projection_dim,), jnp.float32, -lim1, lim1)
        self.w2 = jax.random.uniform(k3, (projection_dim, projection_dim),
                                     jnp.float32, -lim2, lim2)
        self.b2 = jax.random.uniform(k4, (projection_dim,), jnp.float32, -lim2, lim2)

        # Precompute MLP(embedding) for all rows; forward becomes a pure gather.
        self.refresh_table()

    def refresh_table(self):
        # Pad the step axis to a multiple of 8 so every block is sublane-aligned
        # and the one-hot gather matmul is a clean MXU tile.  Padded rows are
        # never selected (steps are clamped to < num_steps).
        Tp = _round_up(self.num_steps, 8)
        emb_pad = jnp.zeros((Tp, self.embedding.shape[1]), jnp.float32)
        emb_pad = emb_pad.at[: self.num_steps].set(self.embedding)
        self.table_out = diffusion_embedding_mlp(
            emb_pad, self.w1, self.b1, self.w2, self.b2)                   # [Tp, P]

    def __call__(self, diffusion_step):
        steps = jnp.asarray(diffusion_step)
        scalar = steps.ndim == 0
        if scalar:
            steps = steps[None]
        # Clamp (OOB indices would otherwise select nothing / wrong rows) + cast once.
        steps = jnp.clip(steps.astype(jnp.int32), 0, self.num_steps - 1)
        out = gather_rows(self.table_out, steps)                           # [B, P]
        return out[0] if scalar else out


# Pure-JAX reference (original module semantics: gather -> Linear -> SiLU -> Linear -> SiLU).
def _ref_forward(module, diffusion_step):
    x = module.embedding[jnp.asarray(diffusion_step)]
    h = x @ module.w1 + module.b1
    h = h * jax.nn.sigmoid(h)
    y = h @ module.w2 + module.b2
    return y * jax.nn.sigmoid(y)


if __name__ == "__main__":
    num_steps = 50
    embedding_dim = 128
    batch = 5                                   # non-multiple of 8: exercises padding path

    module = DiffusionEmbeddingPallas(num_steps, embedding_dim,
                                      key=jax.random.PRNGKey(0))

    step_key = jax.random.PRNGKey(1)
    diffusion_step = jax.random.randint(step_key, (batch,), 0, num_steps)

    out = module(diffusion_step)
    out = jax.block_until_ready(out)

    ref = _ref_forward(module, diffusion_step)
    assert out.shape == (batch, embedding_dim), out.shape
    assert jnp.allclose(out, ref, atol=1e-5, rtol=1e-5), "mismatch vs reference"

    # Scalar-step path (original module also supports a single index).
    out1 = jax.block_until_ready(module(jnp.int32(7)))
    assert out1.shape == (embedding_dim,)
    assert jnp.allclose(out1, _ref_forward(module, 7), atol=1e-5, rtol=1e-5)

    print("KERNEL_OK")
</pallas_src>

<mosaic_0001>
module attributes {stable_mosaic.version = 11 : i64} {
  func.func @_mlp_kernel(%arg0: memref<56x128xf32, #tpu.memory_space<vmem>>, %arg1: memref<128x128xf32, #tpu.memory_space<vmem>>, %arg2: memref<1x128xf32, #tpu.memory_space<vmem>>, %arg3: memref<128x128xf32, #tpu.memory_space<vmem>>, %arg4: memref<1x128xf32, #tpu.memory_space<vmem>>, %arg5: memref<56x128xf32, #tpu.memory_space<vmem>>) attributes {dimension_semantics = [], scalar_prefetch = 0 : i64, scratch_operands = 0 : i64, tpu.core_type = #tpu.core_type<tc>} {
    %c0 = arith.constant 0 : index
    %c0_0 = arith.constant 0 : index
    %0 = vector.load %arg0[%c0, %c0_0] : memref<56x128xf32, #tpu.memory_space<vmem>>, vector<56x128xf32>
    %c0_1 = arith.constant 0 : index
    %c0_2 = arith.constant 0 : index
    %1 = vector.load %arg1[%c0_1, %c0_2] : memref<128x128xf32, #tpu.memory_space<vmem>>, vector<128x128xf32>
    %cst = arith.constant dense<0.000000e+00> : vector<56x128xf32>
    %2 = tpu.matmul %0, %1, %cst {dimension_numbers = #tpu.dot_dimension_numbers<[1], [0], [0], [1], [0, 0, 1, 1], [], []>} : vector<56x128xf32>, vector<128x128xf32>, vector<56x128xf32> -> vector<56x128xf32>
    %c0_3 = arith.constant 0 : index
    %c0_4 = arith.constant 0 : index
    %3 = vector.load %arg2[%c0_3, %c0_4] : memref<1x128xf32, #tpu.memory_space<vmem>>, vector<1x128xf32>
    %4 = vector.broadcast %3 : vector<1x128xf32> to vector<56x128xf32>
    %5 = arith.addf %2, %4 : vector<56x128xf32>
    %6 = arith.negf %5 : vector<56x128xf32>
    %7 = math.exp %6 : vector<56x128xf32>
    %cst_5 = arith.constant 1.000000e+00 : f32
    %8 = vector.broadcast %cst_5 : f32 to vector<56x128xf32>
    %9 = arith.addf %8, %7 : vector<56x128xf32>
    %10 = arith.divf %8, %9 : vector<56x128xf32>
    %11 = arith.mulf %5, %10 : vector<56x128xf32>
    %c0_6 = arith.constant 0 : index
    %c0_7 = arith.constant 0 : index
    %12 = vector.load %arg3[%c0_6, %c0_7] : memref<128x128xf32, #tpu.memory_space<vmem>>, vector<128x128xf32>
    %cst_8 = arith.constant dense<0.000000e+00> : vector<56x128xf32>
    %13 = tpu.matmul %11, %12, %cst_8 {dimension_numbers = #tpu.dot_dimension_numbers<[1], [0], [0], [1], [0, 0, 1, 1], [], []>} : vector<56x128xf32>, vector<128x128xf32>, vector<56x128xf32> -> vector<56x128xf32>
    %c0_9 = arith.constant 0 : index
    %c0_10 = arith.constant 0 : index
    %14 = vector.load %arg4[%c0_9, %c0_10] : memref<1x128xf32, #tpu.memory_space<vmem>>, vector<1x128xf32>
    %15 = vector.broadcast %14 : vector<1x128xf32> to vector<56x128xf32>
    %16 = arith.addf %13, %15 : vector<56x128xf32>
    %17 = arith.negf %16 : vector<56x128xf32>
    %18 = math.exp %17 : vector<56x128xf32>
    %cst_11 = arith.constant 1.000000e+00 : f32
    %19 = vector.broadcast %cst_11 : f32 to vector<56x128xf32>
    %20 = arith.addf %19, %18 : vector<56x128xf32>
    %21 = arith.divf %19, %20 : vector<56x128xf32>
    %22 = arith.mulf %16, %21 : vector<56x128xf32>
    %c0_12 = arith.constant 0 : index
    %c0_13 = arith.constant 0 : index
    %23 = vector.load %arg5[%c0_12, %c0_13] : memref<56x128xf32, #tpu.memory_space<vmem>>, vector<56x128xf32>
    tpu.vector_store %arg5[%c0_12, %c0_13], %22 {strides = array<i32>} : memref<56x128xf32, #tpu.memory_space<vmem>>, vector<56x128xf32>,
    return
  }
}

</mosaic_0001>

<bundles_post_ra>
// kernel: tpu_custom_call.1
= control target key start
LH: loop header
LB: loop body
LE: loop exit
PB: predicated region body
PF: predicated region fallthrough
CT: control target
= control target key end

     0   :  { %10 = vsyncpa [#allocation3], 0  ;;  %s893_s0 = inlined_call_operand.hbm [shape: f32[56,128], index: 0, kind: input, shape index: {}]   ;;  %s894_s1 = inlined_call_operand.hbm [shape: f32[128,128], index: 1, kind: input, shape index: {}]   ;;  %s895_s2 = inlined_call_operand.vmem [shape: f32[1,128], index: 2, kind: input, shape index: {}]   ;;  %s896_s3 = inlined_call_operand.hbm [shape: f32[128,128], index: 3, kind: input, shape index: {}]   ;;  %s897_s4 = inlined_call_operand.vmem [shape: f32[1,128], index: 4, kind: input, shape index: {}]   ;;  %s898_s5 = inlined_call_operand.hbm [shape: f32[56,128], index: 5, kind: output, shape index: {}]  }
   0x1   :  { %11 = vsyncpa [#allocation6], 0 }
   0x2   :  { %12 = vsyncpa [#allocation4], 0  ;;  %s30_s20 = sshll.u32 %s894_s1, 4  ;;  %s710_s21 = smov [#allocation5]   ;;  %s31_s20 = int_to_ptr.hbm [resolvable:$true] %s30_s20 }
   0x3   :  { %s32_s22 = sshll.u32 %s710_s21, 4  ;;  %s17_s25 = sshll.u32 %s893_s0, 4  ;;  %s33_s22 = int_to_ptr.vmem [resolvable:$true] %s32_s22  ;;  %s18_s25 = int_to_ptr.hbm [resolvable:$true] %s17_s25 }
   0x4   :  { %s711_s26 = smov 128   ;;  %s712_s27 = smov 8  }
   0x5   :  { %38 = dma.hbm_to_vmem [thread:$0]  %s31_s20, 2048, %s33_s22, [#allocation6], %s711_s26, %s711_s26, %s712_s27  }
   0x6   :  { %s713_s28 = smov [#allocation2]   ;;  %s45_s1 = sshll.u32 %s896_s3, 4  ;;  %s46_s1 = int_to_ptr.hbm [resolvable:$true] %s45_s1 }
   0x7   :  { %s19_s29 = sshll.u32 %s713_s28, 4  ;;  %s714_s0 = smov [#allocation7]   ;;  %s20_s29 = int_to_ptr.vmem [resolvable:$true] %s19_s29 }
   0x8   :  { %25 = dma.hbm_to_vmem [thread:$0]  %s18_s25, 896, %s20_s29, [#allocation3], %s711_s26, %s711_s26, %s712_s27  }
   0x9   :  { %s47_s7 = sshll.u32 %s714_s0, 4  ;;  %s48_s7 = int_to_ptr.vmem [resolvable:$true] %s47_s7 }
   0xa   :  { %53 = dma.hbm_to_vmem [thread:$0]  %s46_s1, 2048, %s48_s7, [#allocation6], %s711_s26, %s711_s26, %s712_s27  }
   0xb   :  { %704 = dma.done.wait [#allocation3], 896  }
   0xc   :  { %705 = vsyncadd [#allocation3], 4294966400 }
   0xd   :  { %706 = dma.done.wait [#allocation6], 4096  }
   0xe   :  { %707 = vsyncadd [#allocation6], 4294963200  ;;  %v90_v0 = vld [vmem:[#allocation5 + $0x78] sm:$0xff]  ;;  %v89_v1 = vld [vmem:[#allocation5 + $0x70] sm:$0xff]  ;;  %s484_s13 = sshll.u32 %s898_s5, 4  ;;  %s485_s13 = int_to_ptr.hbm [resolvable:$true] %s484_s13 }
   0xf   :  { %95 = vmatpush.msra.mxu0 %v90_v0  ;;  %512 = vmatpush.msra.mxu2 %v90_v0  ;;  %v88_v2 = vld [vmem:[#allocation5 + $0x68] sm:$0xff]  ;;  %v87_v3 = vld [vmem:[#allocation5 + $0x60] sm:$0xff]  ;;  %v86_v4 = vld [vmem:[#allocation5 + $0x58] sm:$0xff] }
  0x10   :  { %v85_v5 = vld [vmem:[#allocation5 + $0x50] sm:$0xff]  ;;  %v84_v6 = vld [vmem:[#allocation5 + $0x48] sm:$0xff]  ;;  %v83_v7 = vld [vmem:[#allocation5 + $0x40] sm:$0xff] }
  0x11   :  { %96 = vmatpush.msra.mxu0 %v89_v1  ;;  %513 = vmatpush.msra.mxu2 %v89_v1  ;;  %v82_v8 = vld [vmem:[#allocation5 + $0x38] sm:$0xff]  ;;  %v81_v9 = vld [vmem:[#allocation5 + $0x30] sm:$0xff]  ;;  %v80_v10 = vld [vmem:[#allocation5 + $0x28] sm:$0xff] }
  0x12   :  { %v79_v11 = vld [vmem:[#allocation5 + $0x20] sm:$0xff]  ;;  %v78_v12 = vld [vmem:[#allocation5 + $0x18] sm:$0xff]  ;;  %v77_v13 = vld [vmem:[#allocation5 + $0x10] sm:$0xff] }
  0x13   :  { %97 = vmatpush.msra.mxu0 %v88_v2  ;;  %514 = vmatpush.msra.mxu2 %v88_v2  ;;  %v76_v14 = vld [vmem:[#allocation5 + $0x8] sm:$0xff]  ;;  %v75_v15 = vld [vmem:[#allocation5] sm:$0xff]  ;;  %v69_v18 = vld [vmem:[#allocation2 + $0x8] sm:$0xff] }
  0x14   :  { %v68_v16 = vld [vmem:[#allocation2] sm:$0xff]  ;;  %v71_v17 = vld [vmem:[#allocation2 + $0x18] sm:$0xff]  ;;  %v70_v20 = vld [vmem:[#allocation2 + $0x10] sm:$0xff] }
  0x15   :  { %98 = vmatpush.msra.mxu0 %v87_v3  ;;  %515 = vmatpush.msra.mxu2 %v87_v3  ;;  %v72_v19 = vld [vmem:[#allocation2 + $0x20] sm:$0xff]  ;;  %v73_v21 = vld [vmem:[#allocation2 + $0x28] sm:$0xff]  ;;  %v74_v22 = vld [vmem:[#allocation2 + $0x30] sm:$0xff] }
  0x16   :  { %v288_v23 = vld [vmem:[#allocation7 + $0x78] sm:$0xff]  ;;  %v287_v24 = vld [vmem:[#allocation7 + $0x70] sm:$0xff]  ;;  %v286_v25 = vld [vmem:[#allocation7 + $0x68] sm:$0xff] }
  0x17   :  { %99 = vmatpush.msra.mxu0 %v86_v4  ;;  %516 = vmatpush.msra.mxu2 %v86_v4  ;;  %v285_v26 = vld [vmem:[#allocation7 + $0x60] sm:$0xff]  ;;  %v284_v27 = vld [vmem:[#allocation7 + $0x58] sm:$0xff]  ;;  %v283_v28 = vld [vmem:[#allocation7 + $0x50] sm:$0xff] }
  0x18   :  { %293 = vmatpush.msra.mxu1 %v288_v23  ;;  %528 = vmatpush.msra.mxu3 %v288_v23  ;;  %v282_v29 = vld [vmem:[#allocation7 + $0x48] sm:$0xff]  ;;  %v281_v30 = vld [vmem:[#allocation7 + $0x40] sm:$0xff]  ;;  %v280_v31 = vld [vmem:[#allocation7 + $0x38] sm:$0xff] }
  0x19   :  { %100 = vmatpush.msra.mxu0 %v85_v5  ;;  %517 = vmatpush.msra.mxu2 %v85_v5  ;;  %v279_v32 = vld [vmem:[#allocation7 + $0x30] sm:$0xff]  ;;  %v278_v33 = vld [vmem:[#allocation7 + $0x28] sm:$0xff]  ;;  %v277_v34 = vld [vmem:[#allocation7 + $0x20] sm:$0xff] }
  0x1a   :  { %294 = vmatpush.msra.mxu1 %v287_v24  ;;  %529 = vmatpush.msra.mxu3 %v287_v24  ;;  %v276_v35 = vld [vmem:[#allocation7 + $0x18] sm:$0xff]  ;;  %v275_v36 = vld [vmem:[#allocation7 + $0x10] sm:$0xff]  ;;  %v767_v37 = vld [vmem:[%s895_s2] ss:$0 sm:$0xff] }
  0x1b   :  { %101 = vmatpush.msra.mxu0 %v84_v6  ;;  %518 = vmatpush.msra.mxu2 %v84_v6  ;;  %v274_v38 = vld [vmem:[#allocation7 + $0x8] sm:$0xff]  ;;  %v273_v39 = vld [vmem:[#allocation7] sm:$0xff] }
  0x1c   :  { %295 = vmatpush.msra.mxu1 %v286_v25  ;;  %530 = vmatpush.msra.mxu3 %v286_v25 }
  0x1d   :  { %102 = vmatpush.msra.mxu0 %v83_v7  ;;  %519 = vmatpush.msra.mxu2 %v83_v7 }
  0x1e   :  { %296 = vmatpush.msra.mxu1 %v285_v26  ;;  %531 = vmatpush.msra.mxu3 %v285_v26 }
  0x1f   :  { %103 = vmatpush.msra.mxu0 %v82_v8  ;;  %520 = vmatpush.msra.mxu2 %v82_v8 }
  0x20   :  { %297 = vmatpush.msra.mxu1 %v284_v27  ;;  %532 = vmatpush.msra.mxu3 %v284_v27 }
  0x21   :  { %104 = vmatpush.msra.mxu0 %v81_v9  ;;  %521 = vmatpush.msra.mxu2 %v81_v9 }
  0x22   :  { %298 = vmatpush.msra.mxu1 %v283_v28  ;;  %533 = vmatpush.msra.mxu3 %v283_v28 }
  0x23   :  { %105 = vmatpush.msra.mxu0 %v80_v10  ;;  %522 = vmatpush.msra.mxu2 %v80_v10 }
  0x24   :  { %299 = vmatpush.msra.mxu1 %v282_v29  ;;  %534 = vmatpush.msra.mxu3 %v282_v29 }
  0x25   :  { %106 = vmatpush.msra.mxu0 %v79_v11  ;;  %523 = vmatpush.msra.mxu2 %v79_v11 }
  0x26   :  { %300 = vmatpush.msra.mxu1 %v281_v30  ;;  %535 = vmatpush.msra.mxu3 %v281_v30 }
  0x27   :  { %107 = vmatpush.msra.mxu0 %v78_v12  ;;  %524 = vmatpush.msra.mxu2 %v78_v12 }
  0x28   :  { %301 = vmatpush.msra.mxu1 %v280_v31  ;;  %536 = vmatpush.msra.mxu3 %v280_v31 }
  0x29   :  { %108 = vmatpush.msra.mxu0 %v77_v13  ;;  %525 = vmatpush.msra.mxu2 %v77_v13 }
  0x2a   :  { %302 = vmatpush.msra.mxu1 %v279_v32  ;;  %537 = vmatpush.msra.mxu3 %v279_v32 }
  0x2b   :  { %109 = vmatpush.msra.mxu0 %v76_v14  ;;  %526 = vmatpush.msra.mxu2 %v76_v14 }
  0x2c   :  { %303 = vmatpush.msra.mxu1 %v278_v33  ;;  %538 = vmatpush.msra.mxu3 %v278_v33 }
  0x2d   :  { %110 = vmatpush.msra.mxu0 %v75_v15  ;;  %527 = vmatpush.msra.mxu2 %v75_v15 }
  0x2e   :  { %111 = vmatmul.f32.vlgmr.msra.gmra.mxu0 %v68_v16  ;;  %120 = vmatmul.f32.vlgmr.msra.gmra.mxu2 %v71_v17 }
  0x2f   :  { %304 = vmatpush.msra.mxu1 %v277_v34  ;;  %539 = vmatpush.msra.mxu3 %v277_v34 }
  0x31   :  { %305 = vmatpush.msra.mxu1 %v276_v35  ;;  %540 = vmatpush.msra.mxu3 %v276_v35 }
  0x33   :  { %306 = vmatpush.msra.mxu1 %v275_v36  ;;  %541 = vmatpush.msra.mxu3 %v275_v36 }
  0x35   :  { %307 = vmatpush.msra.mxu1 %v274_v38  ;;  %542 = vmatpush.msra.mxu3 %v274_v38 }
  0x36   :  { %114 = vmatmul.f32.gmra.mxu0 %v69_v18  ;;  %123 = vmatmul.f32.gmra.mxu2 %v72_v19 }
  0x37   :  { %308 = vmatpush.msra.mxu1 %v273_v39  ;;  %543 = vmatpush.msra.mxu3 %v273_v39 }
  0x3e   :  { %117 = vmatmul.f32.gmra.mxu0 %v70_v20  ;;  %126 = vmatmul.f32.gmra.mxu2 %v73_v21 }
  0x46   :  { %129 = vmatmul.f32.gmra.mxu2 %v74_v22 }
  0xab   :  { %v112_v40 = vpop.f32.mrf.mxu0 }
  0xac   :  { %v113_v41 = vadd.f32 %v767_v37, %v112_v40 }
  0xae   :  { %v498_v42 = vmul.f32 -1.442695, %v113_v41 }
  0xb0   :  { %552 = vpow2.f32 %v498_v42 }
  0xb1   :  { %v121_v43 = vpop.f32.mrf.mxu2 }
  0xb2   :  { %v771_v44 = vadd.f32 %v767_v37, %v121_v43 }
  0xb3   :  { %v115_v45 = vpop.f32.mrf.mxu0 }
  0xb4   :  { %v501_v46 = vmul.f32 -1.442695, %v771_v44  ;;  %v775_v47 = vadd.f32 %v767_v37, %v115_v45 }
  0xb6   :  { %v553_v48 = vpop.eup %552  ;;  %554 = vpow2.f32 %v501_v46  ;;  %v499_v49 = vmul.f32 -1.442695, %v775_v47 }
  0xb7   :  { %v154_v50 = vadd.f32 1.0, %v553_v48 }
  0xb8   :  { %556 = vpow2.f32 %v499_v49 }
  0xb9   :  { %558 = vrcp.f32 %v154_v50  ;;  %v124_v51 = vpop.f32.mrf.mxu2  ;;  %vm166_vm0 = vweird.f32 %v154_v50  ;;  %v172_v0 = vand.u32 2147483648, %v154_v50  ;;  %v170_v3 = vand.u32 2147483647, %v154_v50 }
  0xba   :  { %v779_v52 = vadd.f32 %v767_v37, %v124_v51 }
  0xbb   :  { %v118_v53 = vpop.f32.mrf.mxu0  ;;  %v173_v9 = vor.u32 1.1754944e-38, %v172_v0  ;;  %vm171_vm3 = vcmp.eq.f32.partialorder %v170_v3, 8.507059e+37 }
  0xbc   :  { %v555_v54 = vpop.eup %554  ;;  %v502_v55 = vmul.f32 -1.442695, %v779_v52  ;;  %v783_v56 = vadd.f32 %v767_v37, %v118_v53 }
  0xbd   :  { %v786_v60 = vadd.f32 1.0, %v555_v54 }
  0xbe   :  { %v557_v57 = vpop.eup %556  ;;  %560 = vpow2.f32 %v502_v55  ;;  %v500_v58 = vmul.f32 -1.442695, %v783_v56 }
  0xbf   :  { %v559_v59 = vpop.eup %558  ;;  %v155_v61 = vadd.f32 1.0, %v557_v57 }
  0xc0   :  { %562 = vpow2.f32 %v500_v58  ;;  %v162_v62 = vmul.f32 %v559_v59, %v154_v50  ;;  %vm167_vm1 = vweird.f32 %v559_v59 }
  0xc1   :  { %564 = vrcp.f32 %v155_v61  ;;  %v127_v63 = vpop.f32.mrf.mxu2  ;;  %vm795_vm2 = vmor %vm166_vm0, %vm167_vm1  ;;  %vm181_vm4 = vweird.f32 %v155_v61  ;;  %v185_v19 = vand.u32 2147483647, %v155_v61  ;;  %v187_v20 = vand.u32 2147483648, %v155_v61 }
  0xc2   :  { %v789_v1 = vadd.f32 %v767_v37, %v127_v63  ;;  %v163_v2 = vsub.f32 1.0, %v162_v62  ;;  %566 = vrcp.f32 %v786_v60  ;;  %vm211_vm0 = vweird.f32 %v786_v60 }
  0xc3   :  { %v188_v31 = vor.u32 1.1754944e-38, %v187_v20  ;;  %vm186_vm7 = vcmp.eq.f32.partialorder %v185_v19, 8.507059e+37 }
  0xc4   :  { %v561_v4 = vpop.eup %560  ;;  %v503_v5 = vmul.f32 -1.442695, %v789_v1  ;;  %v164_v6 = vmul.f32 %v559_v59, %v163_v2 }
  0xc5   :  { %v793_v7 = vadd.f32 1.0, %v561_v4 }
  0xc6   :  { %v563_v10 = vpop.eup %562  ;;  %568 = vpow2.f32 %v503_v5  ;;  %v165_v11 = vadd.f32 %v559_v59, %v164_v6  ;;  %v215_v6 = vand.u32 2147483647, %v786_v60 }
  0xc7   :  { %v565_v12 = vpop.eup %564  ;;  %570 = vrcp.f32 %v793_v7  ;;  %v156_v13 = vadd.f32 1.0, %v563_v10  ;;  %v230_v35 = vand.u32 2147483647, %v793_v7  ;;  %v232_v36 = vand.u32 2147483648, %v793_v7 }
  0xc8   :  { %v169_v14 = vsel %vm795_vm2, %v559_v59, %v165_v11  ;;  %v177_v15 = vmul.f32 %v565_v12, %v155_v61  ;;  %v802_v16 = vpop.eup %566  ;;  %vm182_vm5 = vweird.f32 %v565_v12  ;;  %vm226_vm11 = vweird.f32 %v793_v7 }
  0xc9   :  { %572 = vrcp.f32 %v156_v13  ;;  %v130_v17 = vpop.f32.mrf.mxu2  ;;  %v174_v18 = vsel %vm171_vm3, %v173_v9, %v169_v14  ;;  %v207_v27 = vmul.f32 %v802_v16, %v786_v60  ;;  %vm813_vm6 = vmor %vm181_vm4, %vm182_vm5  ;;  %vm196_vm8 = vweird.f32 %v156_v13 }
  0xca   :  { %v805_v21 = vadd.f32 %v767_v37, %v130_v17  ;;  %v266_v22 = vmul.f32 %v174_v18, %v113_v41  ;;  %v178_v23 = vsub.f32 1.0, %v177_v15  ;;  %v200_v42 = vand.u32 2147483647, %v156_v13 }
  0xcb   :  { %v208_v40 = vsub.f32 1.0, %v207_v27  ;;  %v202_v43 = vand.u32 2147483648, %v156_v13  ;;  %vm231_vm13 = vcmp.eq.f32.partialorder %v230_v35, 8.507059e+37  ;;  %v233_v57 = vor.u32 1.1754944e-38, %v232_v36 }
  0xcc   :  { %v569_v24 = vpop.eup %568  ;;  %v504_v25 = vmul.f32 -1.442695, %v805_v21  ;;  %309 = vmatmul.f32.vlgmr.msra.gmra.mxu1 %v266_v22  ;;  %v179_v26 = vmul.f32 %v565_v12, %v178_v23  ;;  %vm201_vm15 = vcmp.eq.f32.partialorder %v200_v42, 8.507059e+37  ;;  %vm212_vm1 = vweird.f32 %v802_v16 }
  0xcd   :  { %v571_v28 = vpop.eup %570  ;;  %v810_v29 = vadd.f32 1.0, %v569_v24  ;;  %v209_v53 = vmul.f32 %v802_v16, %v208_v40  ;;  %v203_v58 = vor.u32 1.1754944e-38, %v202_v43  ;;  %vm213_vm3 = vmor %vm211_vm0, %vm212_vm1 }
  0xce   :  { %574 = vpow2.f32 %v504_v25  ;;  %v180_v32 = vadd.f32 %v565_v12, %v179_v26  ;;  %v222_v33 = vmul.f32 %v571_v28, %v793_v7  ;;  %vm227_vm9 = vweird.f32 %v571_v28 }
  0xcf   :  { %v573_v34 = vpop.eup %572  ;;  %576 = vrcp.f32 %v810_v29  ;;  %vm228_vm12 = vmor %vm226_vm11, %vm227_vm9  ;;  %v210_v3 = vadd.f32 %v802_v16, %v209_v53  ;;  %v247_v5 = vand.u32 2147483648, %v810_v29  ;;  %v217_v7 = vand.u32 2147483648, %v786_v60 }
  0xd0   :  { %v184_v37 = vsel %vm813_vm6, %v565_v12, %v180_v32  ;;  %v223_v38 = vsub.f32 1.0, %v222_v33  ;;  %v192_v39 = vmul.f32 %v573_v34, %v156_v13  ;;  %vm197_vm10 = vweird.f32 %v573_v34 }
  0xd1   :  { %v189_v41 = vsel %vm186_vm7, %v188_v31, %v184_v37  ;;  %vm198_vm14 = vmor %vm196_vm8, %vm197_vm10  ;;  %v245_v10 = vand.u32 2147483647, %v810_v29  ;;  %vm241_vm4 = vweird.f32 %v810_v29  ;;  %v214_v11 = vsel %vm213_vm3, %v802_v16, %v210_v3 }
  0xd2   :  { %v267_v45 = vmul.f32 %v189_v41, %v775_v47  ;;  %v224_v46 = vmul.f32 %v571_v28, %v223_v38  ;;  %v193_v48 = vsub.f32 1.0, %v192_v39  ;;  %v248_v13 = vor.u32 1.1754944e-38, %v247_v5 }
  0xd3   :  { %v218_v14 = vor.u32 1.1754944e-38, %v217_v7  ;;  %vm246_vm6 = vcmp.eq.f32.partialorder %v245_v10, 8.507059e+37  ;;  %vm216_vm7 = vcmp.eq.f32.partialorder %v215_v6, 8.507059e+37 }
  0xd4   :  { %v575_v49 = vpop.eup %574  ;;  %312 = vmatmul.f32.gmra.mxu1 %v267_v45  ;;  %v225_v50 = vadd.f32 %v571_v28, %v224_v46  ;;  %v194_v51 = vmul.f32 %v573_v34, %v193_v48 }
  0xd5   :  { %v577_v54 = vpop.eup %576  ;;  %v160_v55 = vadd.f32 1.0, %v575_v49  ;;  %v219_v18 = vsel %vm216_vm7, %v218_v14, %v214_v11 }
  0xd6   :  { %v229_v47 = vsel %vm228_vm12, %v571_v28, %v225_v50  ;;  %v195_v59 = vadd.f32 %v573_v34, %v194_v51  ;;  %v237_v61 = vmul.f32 %v577_v54, %v810_v29  ;;  %vm242_vm2 = vweird.f32 %v577_v54 }
  0xd7   :  { %578 = vrcp.f32 %v160_v55  ;;  %v234_v62 = vsel %vm231_vm13, %v233_v57, %v229_v47  ;;  %vm243_vm5 = vmor %vm241_vm4, %vm242_vm2  ;;  %v262_v20 = vand.u32 2147483648, %v160_v55  ;;  %v269_v22 = vmul.f32 %v219_v18, %v771_v44 }
  0xd8   :  { %v270_v63 = vmul.f32 %v234_v62, %v779_v52  ;;  %v199_v0 = vsel %vm198_vm14, %v573_v34, %v195_v59  ;;  %v238_v2 = vsub.f32 1.0, %v237_v61  ;;  %v260_v16 = vand.u32 2147483647, %v160_v55 }
  0xd9   :  { %v204_v4 = vsel %vm201_vm15, %v203_v58, %v199_v0  ;;  %vm256_vm9 = vweird.f32 %v160_v55  ;;  %v263_v25 = vor.u32 1.1754944e-38, %v262_v20 }
  0xda   :  { %321 = vmatmul.f32.vlgmr.msra.gmra.mxu3 %v270_v63  ;;  %v268_v8 = vmul.f32 %v204_v4, %v783_v56  ;;  %v239_v9 = vmul.f32 %v577_v54, %v238_v2  ;;  %vm261_vm11 = vcmp.eq.f32.partialorder %v260_v16, 8.507059e+37 }
  0xdc   :  { %315 = vmatmul.f32.gmra.mxu1 %v268_v8  ;;  %v240_v52 = vadd.f32 %v577_v54, %v239_v9 }
  0xdd   :  { %v579_v12 = vpop.eup %578 }
  0xde   :  { %v244_v15 = vsel %vm243_vm5, %v577_v54, %v240_v52  ;;  %v252_v56 = vmul.f32 %v579_v12, %v160_v55  ;;  %vm257_vm8 = vweird.f32 %v579_v12 }
  0xdf   :  { %v249_v17 = vsel %vm246_vm6, %v248_v13, %v244_v15  ;;  %vm258_vm10 = vmor %vm256_vm9, %vm257_vm8 }
  0xe0   :  { %v271_v19 = vmul.f32 %v249_v17, %v789_v1  ;;  %v253_v60 = vsub.f32 1.0, %v252_v56  ;;  %v847_v1 = vld [vmem:[%s897_s4] ss:$0 sm:$0xff]  ;;  %s715_s4 = smov [#allocation8]  }
  0xe1   :  { %s482_s10 = sshll.u32 %s715_s4, 4  ;;  %s483_s10 = int_to_ptr.vmem [resolvable:$true] %s482_s10 }
  0xe2   :  { %324 = vmatmul.f32.gmra.mxu3 %v271_v19  ;;  %v254_v23 = vmul.f32 %v579_v12, %v253_v60 }
  0xe4   :  { %318 = vmatmul.f32.gmra.mxu1 %v269_v22  ;;  %v255_v24 = vadd.f32 %v579_v12, %v254_v23 }
  0xe6   :  { %v259_v26 = vsel %vm258_vm10, %v579_v12, %v255_v24 }
  0xe7   :  { %v264_v27 = vsel %vm261_vm11, %v263_v25, %v259_v26 }
  0xe8   :  { %v272_v28 = vmul.f32 %v264_v27, %v805_v21 }
  0xea   :  { %327 = vmatmul.f32.gmra.mxu3 %v272_v28 }
 0x149   :  { %v310_v44 = vpop.f32.mrf.mxu1 }
 0x14a   :  { %v311_v29 = vadd.f32 %v847_v1, %v310_v44 }
 0x14c   :  { %v505_v30 = vmul.f32 -1.442695, %v311_v29 }
 0x14e   :  { %580 = vpow2.f32 %v505_v30 }
 0x151   :  { %v313_v31 = vpop.f32.mrf.mxu1 }
 0x152   :  { %v851_v32 = vadd.f32 %v847_v1, %v313_v31 }
 0x154   :  { %v581_v33 = vpop.eup %580  ;;  %v506_v34 = vmul.f32 -1.442695, %v851_v32 }
 0x155   :  { %v352_v35 = vadd.f32 1.0, %v581_v33 }
 0x156   :  { %582 = vpow2.f32 %v506_v34 }
 0x157   :  { %584 = vrcp.f32 %v352_v35  ;;  %v368_v48 = vand.u32 2147483647, %v352_v35  ;;  %v370_v49 = vand.u32 2147483648, %v352_v35  ;;  %vm364_vm13 = vweird.f32 %v352_v35 }
 0x159   :  { %v316_v21 = vpop.f32.mrf.mxu1  ;;  %v371_v47 = vor.u32 1.1754944e-38, %v370_v49  ;;  %vm369_vm15 = vcmp.eq.f32.partialorder %v368_v48, 8.507059e+37 }
 0x15a   :  { %v855_v36 = vadd.f32 %v847_v1, %v316_v21 }
 0x15c   :  { %v583_v37 = vpop.eup %582  ;;  %v507_v38 = vmul.f32 -1.442695, %v855_v36 }
 0x15d   :  { %v585_v39 = vpop.eup %584  ;;  %v353_v40 = vadd.f32 1.0, %v583_v37  ;;  %v322_v41 = vpop.f32.mrf.mxu3 }
 0x15e   :  { %v360_v42 = vmul.f32 %v585_v39, %v352_v35  ;;  %586 = vpow2.f32 %v507_v38  ;;  %v859_v43 = vadd.f32 %v847_v1, %v322_v41  ;;  %vm365_vm12 = vweird.f32 %v585_v39 }
 0x15f   :  { %588 = vrcp.f32 %v353_v40  ;;  %vm366_vm14 = vmor %vm364_vm13, %vm365_vm12  ;;  %v385_v6 = vand.u32 2147483648, %v353_v40  ;;  %v383_v9 = vand.u32 2147483647, %v353_v40  ;;  %vm379_vm1 = vweird.f32 %v353_v40 }
 0x160   :  { %v361_v45 = vsub.f32 1.0, %v360_v42  ;;  %v509_v46 = vmul.f32 -1.442695, %v859_v43 }
 0x161   :  { %v319_v50 = vpop.f32.mrf.mxu1  ;;  %v386_v13 = vor.u32 1.1754944e-38, %v385_v6  ;;  %vm384_vm3 = vcmp.eq.f32.partialorder %v383_v9, 8.507059e+37 }
 0x162   :  { %v362_v51 = vmul.f32 %v585_v39, %v361_v45  ;;  %590 = vpow2.f32 %v509_v46  ;;  %v863_v53 = vadd.f32 %v847_v1, %v319_v50 }
 0x164   :  { %v587_v54 = vpop.eup %586  ;;  %v363_v55 = vadd.f32 %v585_v39, %v362_v51  ;;  %v508_v57 = vmul.f32 -1.442695, %v863_v53 }
 0x165   :  { %v589_v58 = vpop.eup %588  ;;  %v354_v59 = vadd.f32 1.0, %v587_v54  ;;  %v325_v61 = vpop.f32.mrf.mxu3 }
 0x166   :  { %v367_v62 = vsel %vm366_vm14, %v585_v39, %v363_v55  ;;  %v375_v63 = vmul.f32 %v589_v58, %v353_v40  ;;  %592 = vpow2.f32 %v508_v57  ;;  %v867_v5 = vadd.f32 %v847_v1, %v325_v61 }
 0x167   :  { %v372_v0 = vsel %vm369_vm15, %v371_v47, %v367_v62  ;;  %594 = vrcp.f32 %v354_v59  ;;  %vm380_vm0 = vweird.f32 %v589_v58  ;;  %v398_v22 = vand.u32 2147483647, %v354_v59 }
 0x168   :  { %v591_v2 = vpop.eup %590  ;;  %v464_v3 = vmul.f32 %v372_v0, %v311_v29  ;;  %v376_v4 = vsub.f32 1.0, %v375_v63  ;;  %v510_v10 = vmul.f32 -1.442695, %v867_v5  ;;  %vm381_vm2 = vmor %vm379_vm1, %vm380_vm0  ;;  %v400_v24 = vand.u32 2147483648, %v354_v59 }
 0x169   :  { %v356_v7 = vadd.f32 1.0, %v591_v2  ;;  %vm394_vm5 = vweird.f32 %v354_v59  ;;  %vm399_vm6 = vcmp.eq.f32.partialorder %v398_v22, 8.507059e+37 }
 0x16a   :  { %471 = vst [vmem:[#allocation8] sm:$0xff] %v464_v3  ;;  %v377_v8 = vmul.f32 %v589_v58, %v376_v4  ;;  %v401_v30 = vor.u32 1.1754944e-38, %v400_v24 }
 0x16b   :  { %596 = vrcp.f32 %v356_v7  ;;  %v428_v31 = vand.u32 2147483647, %v356_v7  ;;  %vm424_vm9 = vweird.f32 %v356_v7 }
 0x16c   :  { %v593_v52 = vpop.eup %592  ;;  %v378_v11 = vadd.f32 %v589_v58, %v377_v8  ;;  %598 = vpow2.f32 %v510_v10 }
 0x16d   :  { %v595_v12 = vpop.eup %594  ;;  %v870_v14 = vadd.f32 1.0, %v593_v52  ;;  %v328_v15 = vpop.f32.mrf.mxu3  ;;  %vm429_vm11 = vcmp.eq.f32.partialorder %v428_v31, 8.507059e+37 }
 0x16e   :  { %v382_v56 = vsel %vm381_vm2, %v589_v58, %v378_v11  ;;  %v390_v17 = vmul.f32 %v595_v12, %v354_v59  ;;  %v873_v18 = vadd.f32 %v847_v1, %v328_v15  ;;  %vm395_vm4 = vweird.f32 %v595_v12 }
 0x16f   :  { %v387_v19 = vsel %vm384_vm3, %v386_v13, %v382_v56  ;;  %600 = vrcp.f32 %v870_v14  ;;  %vm396_vm7 = vmor %vm394_vm5, %vm395_vm4  ;;  %v413_v42 = vand.u32 2147483647, %v870_v14  ;;  %v415_v45 = vand.u32 2147483648, %v870_v14 }
 0x170   :  { %v465_v60 = vmul.f32 %v387_v19, %v851_v32  ;;  %v391_v20 = vsub.f32 1.0, %v390_v17  ;;  %v511_v23 = vmul.f32 -1.442695, %v873_v18  ;;  %v430_v32 = vand.u32 2147483648, %v356_v7 }
 0x171   :  { %v597_v16 = vpop.eup %596  ;;  %vm409_vm13 = vweird.f32 %v870_v14  ;;  %v416_v57 = vor.u32 1.1754944e-38, %v415_v45  ;;  %vm414_vm15 = vcmp.eq.f32.partialorder %v413_v42, 8.507059e+37 }
 0x172   :  { %v599_v25 = vpop.eup %598  ;;  %472 = vst [vmem:[#allocation8 + $0x8] sm:$0xff] %v465_v60  ;;  %v392_v26 = vmul.f32 %v595_v12, %v391_v20  ;;  %v420_v27 = vmul.f32 %v597_v16, %v356_v7  ;;  %602 = vpow2.f32 %v511_v23  ;;  %vm425_vm8 = vweird.f32 %v597_v16 }
 0x173   :  { %v357_v28 = vadd.f32 1.0, %v599_v25  ;;  %vm426_vm10 = vmor %vm424_vm9, %vm425_vm8  ;;  %v431_v41 = vor.u32 1.1754944e-38, %v430_v32 }
 0x174   :  { %v393_v1 = vadd.f32 %v595_v12, %v392_v26  ;;  %v421_v44 = vsub.f32 1.0, %v420_v27 }
 0x175   :  { %v601_v29 = vpop.eup %600  ;;  %604 = vrcp.f32 %v357_v28  ;;  %v445_v61 = vand.u32 2147483648, %v357_v28  ;;  %v443_v0 = vand.u32 2147483647, %v357_v28  ;;  %vm439_vm1 = vweird.f32 %v357_v28 }
 0x176   :  { %v397_v33 = vsel %vm396_vm7, %v595_v12, %v393_v1  ;;  %v422_v34 = vmul.f32 %v597_v16, %v421_v44  ;;  %v405_v35 = vmul.f32 %v601_v29, %v870_v14  ;;  %vm410_vm12 = vweird.f32 %v601_v29 }
 0x177   :  { %v402_v21 = vsel %vm399_vm6, %v401_v30, %v397_v33  ;;  %vm411_vm14 = vmor %vm409_vm13, %vm410_vm12  ;;  %v446_v3 = vor.u32 1.1754944e-38, %v445_v61  ;;  %vm444_vm3 = vcmp.eq.f32.partialorder %v443_v0, 8.507059e+37 }
 0x178   :  { %v466_v37 = vmul.f32 %v402_v21, %v855_v36  ;;  %v423_v38 = vadd.f32 %v597_v16, %v422_v34  ;;  %v406_v39 = vsub.f32 1.0, %v405_v35  ;;  %v603_v40 = vpop.eup %602 }
 0x179   :  { %v358_v49 = vadd.f32 1.0, %v603_v40 }
 0x17a   :  { %473 = vst [vmem:[#allocation8 + $0x10] sm:$0xff] %v466_v37  ;;  %v427_v46 = vsel %vm426_vm10, %v597_v16, %v423_v38  ;;  %v407_v48 = vmul.f32 %v601_v29, %v406_v39 }
 0x17b   :  { %v605_v50 = vpop.eup %604  ;;  %v432_v51 = vsel %vm429_vm11, %v431_v41, %v427_v46  ;;  %606 = vrcp.f32 %v358_v49  ;;  %v460_v10 = vand.u32 2147483648, %v358_v49  ;;  %vm454_vm5 = vweird.f32 %v358_v49 }
 0x17c   :  { %v468_v36 = vmul.f32 %v432_v51, %v859_v43  ;;  %v408_v54 = vadd.f32 %v601_v29, %v407_v48  ;;  %v435_v55 = vmul.f32 %v605_v50, %v357_v28  ;;  %vm440_vm0 = vweird.f32 %v605_v50 }
 0x17d   :  { %vm441_vm2 = vmor %vm439_vm1, %vm440_vm0  ;;  %v461_v12 = vor.u32 1.1754944e-38, %v460_v10 }
 0x17e   :  { %475 = vst [vmem:[#allocation8 + $0x20] sm:$0xff] %v468_v36  ;;  %v412_v58 = vsel %vm411_vm14, %v601_v29, %v408_v54  ;;  %v436_v47 = vsub.f32 1.0, %v435_v55 }
 0x17f   :  { %v417_v59 = vsel %vm414_vm15, %v416_v57, %v412_v58 }
 0x180   :  { %v467_v62 = vmul.f32 %v417_v59, %v863_v53  ;;  %v437_v63 = vmul.f32 %v605_v50, %v436_v47  ;;  %v458_v53 = vand.u32 2147483647, %v358_v49 }
 0x181   :  { %v607_v2 = vpop.eup %606 }
 0x182   :  { %474 = vst [vmem:[#allocation8 + $0x18] sm:$0xff] %v467_v62  ;;  %v438_v43 = vadd.f32 %v605_v50, %v437_v63  ;;  %v450_v6 = vmul.f32 %v607_v2, %v358_v49  ;;  %vm455_vm4 = vweird.f32 %v607_v2  ;;  %vm459_vm7 = vcmp.eq.f32.partialorder %v458_v53, 8.507059e+37 }
 0x183   :  { %vm456_vm6 = vmor %vm454_vm5, %vm455_vm4 }
 0x184   :  { %v442_v4 = vsel %vm441_vm2, %v605_v50, %v438_v43  ;;  %v451_v9 = vsub.f32 1.0, %v450_v6 }
 0x185   :  { %v447_v7 = vsel %vm444_vm3, %v446_v3, %v442_v4 }
 0x186   :  { %v469_v8 = vmul.f32 %v447_v7, %v867_v5  ;;  %v452_v52 = vmul.f32 %v607_v2, %v451_v9 }
 0x188   :  { %476 = vst [vmem:[#allocation8 + $0x28] sm:$0xff] %v469_v8  ;;  %v453_v11 = vadd.f32 %v607_v2, %v452_v52 }
 0x18a   :  { %v457_v13 = vsel %vm456_vm6, %v607_v2, %v453_v11 }
 0x18b   :  { %v462_v14 = vsel %vm459_vm7, %v461_v12, %v457_v13 }
 0x18c   :  { %v470_v5 = vmul.f32 %v462_v14, %v873_v18 }
 0x18e   :  { %477 = vst [vmem:[#allocation8 + $0x30] sm:$0xff] %v470_v5 }
 0x18f   :  { %490 = dma.vmem_to_hbm [thread:$0]  %s483_s10, 896, %s485_s13, [#allocation4], %s711_s26, %s711_s26, %s712_s27  }
 0x190   :  { %708 = dma.done.wait [#allocation4], 896  }
 0x191   :  { %709 = vsyncadd [#allocation4], 4294966400 }
 0x192   :  { %495 = vsyncpa [#allocation3], 1 }
 0x193   :  { %496 = vsyncpa [#allocation6], 1 }
 0x194   :  { %497 = vsyncpa [#allocation4], 1 }

</bundles_post_ra>
